<compile_context>
chip_gen: v6e
topology: v6e:2x2x1
jax: 0.10.0
libtpu: 0.0.40
codegen_flags: <defaults>
</compile_context>

<pallas_src>
import functools

import jax
import jax.numpy as jnp
import numpy as np
from jax import lax
from jax.experimental import pallas as pl
from jax.experimental.pallas import tpu as pltpu


def _round_up(x, m):
    return ((x + m - 1) // m) * m


def _mean_encoder_kernel(idx_ref, tab_ref, out_ref, *, tv, s_chunk, inv_seq_len,
                         counts_dtype):
    """Grid = (num_batch_tiles ['parallel'], num_vocab_tiles ['arbitrary']).

    idx_ref : (TB, S_pad)    int32  token ids for this batch tile (-1 = padding)
    tab_ref : (TV, E_pad)    bf16/f32  vocab tile of the (frozen) embedding table
    out_ref : (TB, E_pad)    f32    output tile, resident across the vocab axis
    """
    vt = pl.program_id(1)

    @pl.when(vt == 0)
    def _init():
        out_ref[...] = jnp.zeros_like(out_ref)

    idx = idx_ref[...]                               # (TB, S_pad) int32
    tb, s_pad = idx.shape
    v_start = vt * tv
    # Shift the ids instead of the iota: TB*S subtracts, not TB*TV*S adds.
    local_idx = idx - v_start                        # (TB, S_pad)

    # Vocab tile on lanes (TV multiple of 128 for realistic V), S chunk on
    # sublanes: full-lane VALU compares; reduce over S is a sublane accumulate.
    lane_iota = lax.broadcasted_iota(jnp.int32, (tb, s_chunk, tv), 2)

    counts = jnp.zeros((tb, tv), jnp.float32)
    for c in range(s_pad // s_chunk):                # static, small unrolled loop
        chunk = local_idx[:, c * s_chunk:(c + 1) * s_chunk]            # (TB, s_chunk)
        onehot = (chunk[:, :, None] == lane_iota).astype(jnp.float32)  # (TB, s_chunk, TV)
        counts = counts + jnp.sum(onehot, axis=1)                      # (TB, TV)

    # One MXU matmul per vocab tile replaces S per-row gather DMAs.
    # counts are exact integers <= S (exact in bf16 whenever S <= 256).
    out_ref[...] += jnp.dot(counts.astype(counts_dtype), tab_ref[...],
                            preferred_element_type=jnp.float32)

    @pl.when(vt == pl.num_programs(1) - 1)
    def _finalize():
        out_ref[...] = out_ref[...] * inv_seq_len    # apply 1/S once


def _choose_vocab_tile(V, E_pad, itemsize, *, tb_nominal=128, s_chunk=8):
    # (a) keep each (double-buffered) table tile <= ~8 MiB so the pipeline fits
    #     comfortably on every generation (v7x: 64 MiB physical VMEM).
    cap_table = (8 * 2**20) // max(1, E_pad * itemsize)
    # (b) keep the in-kernel fp32 intermediates (one-hot chunk + counts) <= ~12 MiB.
    cap_interm = (12 * 2**20) // max(1, tb_nominal * 4 * (s_chunk + 1))
    cap = min(cap_table, cap_interm)
    if cap >= 128:
        return min(_round_up(V, 128), (cap // 128) * 128)   # lane-dense TV
    return max(8, min(_round_up(V, 8), (cap // 8) * 8))


def _choose_batch_tile(B):
    TB = min(_round_up(B, 8), 128)
    B_pad = _round_up(B, TB)
    # Guarantee >=2 blocks on the parallel batch axis when possible so v7x's two
    # TensorCores both get work.
    if B_pad // TB < 2 and B_pad > 8:
        TB = max(8, _round_up(B_pad // 2, 8))
        B_pad = _round_up(B, TB)
    return TB, B_pad


def _mean_encoder_call(indices, tab_padded, *, V, E, TV, s_chunk=8):
    B, S = indices.shape
    assert S > 0, "sequence length must be positive"
    V_pad, E_pad = tab_padded.shape

    TB, B_pad = _choose_batch_tile(B)
    S_pad = _round_up(S, s_chunk)

    idx = indices.astype(jnp.int32)
    if B_pad != B or S_pad != S:
        # -1 matches no vocab id -> padded rows/positions contribute zero.
        idx = jnp.pad(idx, ((0, B_pad - B), (0, S_pad - S)), constant_values=-1)

    # Counts are exact in bf16 only when per-token counts <= 256.
    counts_dtype = tab_padded.dtype if S <= 256 else jnp.float32

    kernel = functools.partial(
        _mean_encoder_kernel, tv=TV, s_chunk=s_chunk,
        inv_seq_len=1.0 / S, counts_dtype=counts_dtype)

    tab_item = jnp.dtype(tab_padded.dtype).itemsize
    vmem_est = (2 * TV * E_pad * tab_item          # double-buffered table tile
                + 2 * TB * S_pad * 4               # double-buffered idx tile
                + 2 * TB * E_pad * 4               # double-buffered output tile
                + TB * TV * 4 * (s_chunk + 2))     # one-hot chunk + counts (+slack)
    vmem_limit = int(min(60 * 2**20, max(40 * 2**20, 2 * vmem_est)))

    out = pl.pallas_call(
        kernel,
        out_shape=jax.ShapeDtypeStruct((B_pad, E_pad), jnp.float32),
        grid=(B_pad // TB, V_pad // TV),
        in_specs=[
            pl.BlockSpec((TB, S_pad), lambda bt, vt: (bt, 0)),     # token ids
            pl.BlockSpec((TV, E_pad), lambda bt, vt: (vt, 0)),     # table V-tile
        ],
        out_specs=pl.BlockSpec((TB, E_pad), lambda bt, vt: (bt, 0)),
        compiler_params=pltpu.CompilerParams(
            dimension_semantics=("parallel", "arbitrary"),
            vmem_limit_bytes=vmem_limit),
    )(idx, tab_padded)

    return out[:B, :E]


def make_mean_encoder(word_embeddings, *, table_dtype=jnp.bfloat16):
    """Build the encoder once: cast/pad the frozen table a single time."""
    V, E = word_embeddings.shape
    E_pad = _round_up(E, 128)
    itemsize = jnp.dtype(table_dtype).itemsize
    TV = _choose_vocab_tile(V, E_pad, itemsize)
    V_pad = _round_up(V, TV)

    # Hoisted out of the per-call path: one-time cast + pad of the frozen table.
    tab_padded = jnp.pad(jnp.asarray(word_embeddings, table_dtype),
                         ((0, V_pad - V), (0, E_pad - E)))

    @jax.jit
    def encode(x):
        return _mean_encoder_call(x, tab_padded, V=V, E=E, TV=TV)

    return encode


if __name__ == "__main__":
    B, S = 2, 8          # batch, sequence length
    V, E = 32, 128       # vocab size, embedding dim

    key = jax.random.PRNGKey(0)
    k_emb, k_idx = jax.random.split(key)

    # Deterministic "pretrained" word embeddings (frozen in the PyTorch module).
    word_embeddings = jax.random.normal(k_emb, (V, E), dtype=jnp.float32)
    # Token ids, including a padding_idx==1 token (forward treats it normally).
    x = jax.random.randint(k_idx, (B, S), minval=0, maxval=V, dtype=jnp.int32)
    x = x.at[0, 0].set(1)

    encoder = make_mean_encoder(word_embeddings)
    out = jax.block_until_ready(encoder(x))
    assert out.shape == (B, E)

    # Reference with the same bf16 table quantization the kernel uses -> tight check.
    tab_q = word_embeddings.astype(jnp.bfloat16).astype(jnp.float32)
    ref_q = tab_q[x].mean(axis=1)
    np.testing.assert_allclose(np.asarray(out), np.asarray(ref_q), rtol=1e-5, atol=1e-5)

    # Full-precision PyTorch-semantics reference (only the bf16 table cast differs).
    ref = word_embeddings[x].mean(axis=1)
    np.testing.assert_allclose(np.asarray(out), np.asarray(ref), rtol=2e-2, atol=2e-2)

    # TODO(synk): for very large vocabularies (V >> S*E) a VMEM-resident gather
    # path would beat the histogram x matmul formulation used here.
    print("KERNEL_OK")
</pallas_src>

<mosaic_0001>
module attributes {stable_mosaic.version = 11 : i64} {
  func.func @_mean_encoder_kernel(%arg0: i32, %arg1: i32, %arg2: memref<8x8xi32, #tpu.memory_space<vmem>>, %arg3: memref<128x128xbf16, #tpu.memory_space<vmem>>, %arg4: memref<8x128xf32, #tpu.memory_space<vmem>>) attributes {dimension_semantics = [#tpu.dimension_semantics<parallel>, #tpu.dimension_semantics<arbitrary>], iteration_bounds = array<i64: 1, 1>, scalar_prefetch = 0 : i64, scratch_operands = 0 : i64, tpu.core_type = #tpu.core_type<tc>, window_params = [{transform_indices = @transform_0, window_bounds = array<i64: 8, 8>}, {transform_indices = @transform_1, window_bounds = array<i64: 128, 128>}, {transform_indices = @transform_2, window_bounds = array<i64: 8, 128>}]} {
    %c0_i32 = arith.constant 0 : i32
    %0 = arith.cmpi eq, %arg1, %c0_i32 : i32
    %1 = arith.extui %0 : i1 to i32
    %c0_i32_0 = arith.constant 0 : i32
    %2 = arith.cmpi ne, %1, %c0_i32_0 : i32
    scf.if %2 {
      %cst_12 = arith.constant 0.000000e+00 : f32
      %25 = vector.broadcast %cst_12 : f32 to vector<8x128xf32>
      %c0_13 = arith.constant 0 : index
      %c0_14 = arith.constant 0 : index
      %26 = vector.load %arg4[%c0_13, %c0_14] : memref<8x128xf32, #tpu.memory_space<vmem>>, vector<8x128xf32>
      tpu.vector_store %arg4[%c0_13, %c0_14], %25 {strides = array<i32>} : memref<8x128xf32, #tpu.memory_space<vmem>>, vector<8x128xf32>,
    } else {
    }
    %c0 = arith.constant 0 : index
    %c0_1 = arith.constant 0 : index
    %3 = vector.load %arg2[%c0, %c0_1] : memref<8x8xi32, #tpu.memory_space<vmem>>, vector<8x8xi32>
    %c128_i32 = arith.constant 128 : i32
    %4 = arith.muli %arg1, %c128_i32 : i32
    %5 = vector.broadcast %4 : i32 to vector<8x8xi32>
    %6 = arith.subi %3, %5 : vector<8x8xi32>
    %7 = tpu.iota {dimensions = array<i32: 2>} : vector<8x8x128xi32>
    %cst = arith.constant 0.000000e+00 : f32
    %8 = vector.broadcast %cst : f32 to vector<8x128xf32>
    %9 = vector.shape_cast %6 : vector<8x8xi32> to vector<8x8x1xi32>
    %10 = vector.broadcast %9 : vector<8x8x1xi32> to vector<8x8x128xi32>
    %11 = arith.cmpi eq, %10, %7 : vector<8x8x128xi32>
    %12 = arith.extui %11 : vector<8x8x128xi1> to vector<8x8x128xi32>
    %13 = arith.sitofp %12 : vector<8x8x128xi32> to vector<8x8x128xf32>
    %cst_2 = arith.constant dense<0.000000e+00> : vector<8x128xf32>
    %14 = vector.multi_reduction <add>, %13, %cst_2 [1] : vector<8x8x128xf32> to vector<8x128xf32>
    %15 = arith.addf %8, %14 : vector<8x128xf32>
    %c0_3 = arith.constant 0 : index
    %c0_4 = arith.constant 0 : index
    %16 = vector.load %arg4[%c0_3, %c0_4] : memref<8x128xf32, #tpu.memory_space<vmem>>, vector<8x128xf32>
    %17 = arith.truncf %15 : vector<8x128xf32> to vector<8x128xbf16>
    %c0_5 = arith.constant 0 : index
    %c0_6 = arith.constant 0 : index
    %18 = vector.load %arg3[%c0_5, %c0_6] : memref<128x128xbf16, #tpu.memory_space<vmem>>, vector<128x128xbf16>
    %cst_7 = arith.constant dense<0.000000e+00> : vector<8x128xf32>
    %19 = tpu.matmul %17, %18, %cst_7 {dimension_numbers = #tpu.dot_dimension_numbers<[1], [0], [0], [1], [0, 0, 1, 1], [], []>} : vector<8x128xbf16>, vector<128x128xbf16>, vector<8x128xf32> -> vector<8x128xf32>
    %20 = arith.addf %16, %19 : vector<8x128xf32>
    %c0_8 = arith.constant 0 : index
    %c0_9 = arith.constant 0 : index
    %21 = vector.load %arg4[%c0_8, %c0_9] : memref<8x128xf32, #tpu.memory_space<vmem>>, vector<8x128xf32>
    tpu.vector_store %arg4[%c0_8, %c0_9], %20 {strides = array<i32>} : memref<8x128xf32, #tpu.memory_space<vmem>>, vector<8x128xf32>,
    %c0_i32_10 = arith.constant 0 : i32
    %22 = arith.cmpi eq, %arg1, %c0_i32_10 : i32
    %23 = arith.extui %22 : i1 to i32
    %c0_i32_11 = arith.constant 0 : i32
    %24 = arith.cmpi ne, %23, %c0_i32_11 : i32
    scf.if %24 {
      %c0_12 = arith.constant 0 : index
      %c0_13 = arith.constant 0 : index
      %25 = vector.load %arg4[%c0_12, %c0_13] : memref<8x128xf32, #tpu.memory_space<vmem>>, vector<8x128xf32>
      %cst_14 = arith.constant 1.250000e-01 : f32
      %26 = vector.broadcast %cst_14 : f32 to vector<8x128xf32>
      %27 = arith.mulf %25, %26 : vector<8x128xf32>
      %c0_15 = arith.constant 0 : index
      %c0_16 = arith.constant 0 : index
      %28 = vector.load %arg4[%c0_15, %c0_16] : memref<8x128xf32, #tpu.memory_space<vmem>>, vector<8x128xf32>
      tpu.vector_store %arg4[%c0_15, %c0_16], %27 {strides = array<i32>} : memref<8x128xf32, #tpu.memory_space<vmem>>, vector<8x128xf32>,
    } else {
    }
    return
  }
  func.func @transform_0(%arg0: i32, %arg1: i32) -> (i32, i32) {
    %c0_i32 = arith.constant 0 : i32
    %c0_i32_0 = arith.constant 0 : i32
    return %arg0, %c0_i32 : i32, i32
  }
  func.func @transform_1(%arg0: i32, %arg1: i32) -> (i32, i32) {
    %c0_i32 = arith.constant 0 : i32
    %c0_i32_0 = arith.constant 0 : i32
    return %arg1, %c0_i32 : i32, i32
  }
  func.func @transform_2(%arg0: i32, %arg1: i32) -> (i32, i32) {
    %c0_i32 = arith.constant 0 : i32
    %c0_i32_0 = arith.constant 0 : i32
    return %arg0, %c0_i32 : i32, i32
  }
}

</mosaic_0001>

<bundles_post_ra>
// kernel: encode.1
= control target key start
LH: loop header
LB: loop body
LE: loop exit
PB: predicated region body
PF: predicated region fallthrough
CT: control target
= control target key end

     0   :  { %7 = vsyncpa [#allocation3], 0  ;;  %s411_s9 = smov [#allocation2]   ;;  %s457_s0 = inlined_call_operand.vmem [shape: s32[8,8], index: 0, kind: input, shape index: {}]   ;;  %s458_s1 = inlined_call_operand.hbm [shape: bf16[128,128], index: 1, kind: input, shape index: {}]   ;;  %s459_s2 = inlined_call_operand.vmem [shape: f32[8,128], index: 2, kind: output, shape index: {}]  }
   0x1   :  { %s15_s10 = sshll.u32 %s411_s9, 4  ;;  %s16_s10 = int_to_ptr.vmem [resolvable:$true] %s15_s10 }
   0x2   :  { %s397_s11 = scalar_lea.vmem %s16_s10, 1024  ;;  %p402_p1 = scmp.lt.s32.totalorder %s16_s10, %s16_s10 }
   0x3   :  { %p398_p0 = scmp.ne.s32.totalorder %s16_s10, %s397_s11  ;;  %p403_p2 = scmp.lt.s32.totalorder %s397_s11, %s397_s11 }
   0x5   :  { %p404_p3 = por %p403_p2, %p402_p1 }
   0x7   :  { %p405_p4 = pnand %p404_p3, %p398_p0 }
   0x9   :  { %408 = shalt.err (!%p405_p4)
}
   0xa   :  { %s412_s12 = smov 64   ;;  %s413_s13 = smov 4  }
   0xb   :  { %21 = dma.hbm_to_vmem [thread:$0]  %s458_s1, 1024, %s16_s10, [#allocation3], %s412_s12, %s412_s12, %s413_s13  }
   0xc   :  { %409 = dma.done.wait [#allocation3], 1024  }
   0xd   :  { %410 = vsyncadd [#allocation3], 4294966272  ;;  %v35_v0 = vlaneseq  ;;  %v414_v1 = vmov 0.0   ;;  %v31_v7 = vld [vmem:[%s457_s0] sm:$0xff]  ;;  %v381_v10 = vld [vmem:[#allocation2 + $0x38] sm:$0xff]   ;;  %vm415_vm0 = vmmov 0  }
   0xe   :  { %356 = vmatprep.subr.bf16.mxu0 %v414_v1  ;;  %v382_v15 = vld [vmem:[#allocation2 + $0x30] sm:$0xff]   ;;  %v383_v20 = vld [vmem:[#allocation2 + $0x28] sm:$0xff]   ;;  %v384_v23 = vld [vmem:[#allocation2 + $0x20] sm:$0xff]   ;;  %372 = vmatprep.mubr.msk.bf16.mxu0 %vm415_vm0, %v414_v1  ;;  %vm214_vm9 = vcmask 1041409   ;;  %vm216_vm10 = vcmask 1042434   ;;  %vm218_vm11 = vcmask 1043459  }
   0xf   :  { %v38_v2 = vshrl.u32 %v35_v0, 7  ;;  %357 = vmatpush3.bf16.msra.mxu0 %v381_v10  ;;  %v385_v24 = vld [vmem:[#allocation2 + $0x18] sm:$0xff]   ;;  %v386_v25 = vld [vmem:[#allocation2 + $0x10] sm:$0xff]   ;;  %v387_v26 = vld [vmem:[#allocation2 + $0x8] sm:$0xff]   ;;  %v36_v28 = vand.u32 127, %v35_v0  ;;  %vm220_vm12 = vcmask 1044484  }
  0x10   :  { %358 = vmatprep.subr.bf16.mxu0 %v414_v1  ;;  %v388_v27 = vld [vmem:[#allocation2] sm:$0xff]   ;;  %vm222_vm13 = vcmask 1045509   ;;  %vm224_vm14 = vcmask 1046534   ;;  %vm226_vm15 = vcmask 1047559  }
  0x11   :  { %v53_v3 = vsub.s32 2, %v38_v2  ;;  %v39_v4 = vsub.s32 0, %v38_v2  ;;  %v60_v5 = vsub.s32 3, %v38_v2  ;;  %v46_v6 = vsub.s32 1, %v38_v2 }
  0x12   :  { %v74_v11 = vsub.s32 5, %v38_v2  ;;  %v67_v14 = vsub.s32 4, %v38_v2  ;;  %v88_v18 = vsub.s32 7, %v38_v2  ;;  %v81_v19 = vsub.s32 6, %v38_v2 }
  0x13   :  { %v54_v8 = vrot.slane %v31_v7, %v53_v3  ;;  %v40_v9 = vrot.slane %v31_v7, %v39_v4  ;;  %v61_v12 = vrot.slane %v31_v7, %v60_v5  ;;  %v47_v13 = vrot.slane %v31_v7, %v46_v6  ;;  %359 = vmatpush3.bf16.msra.mxu0 %v382_v15 }
  0x14   :  { %v75_v16 = vrot.slane %v31_v7, %v74_v11  ;;  %v68_v17 = vrot.slane %v31_v7, %v67_v14  ;;  %360 = vmatprep.subr.bf16.mxu0 %v414_v1  ;;  %v89_v21 = vrot.slane %v31_v7, %v88_v18  ;;  %v82_v22 = vrot.slane %v31_v7, %v81_v19 }
  0x15   :  { %56 = vbcast.lane.b32.xlu1 %v54_v8, 256  ;;  %42 = vbcast.lane.b32.xlu0 %v40_v9, 256 }
  0x17   :  { %361 = vmatpush3.bf16.msra.mxu0 %v383_v20 }
  0x18   :  { %362 = vmatprep.subr.bf16.mxu0 %v414_v1 }
  0x19   :  { %63 = vbcast.lane.b32.xlu1 %v61_v12, 256  ;;  %49 = vbcast.lane.b32.xlu0 %v47_v13, 256 }
  0x1b   :  { %363 = vmatpush3.bf16.msra.mxu0 %v384_v23 }
  0x1c   :  { %364 = vmatprep.subr.bf16.mxu0 %v414_v1 }
  0x1d   :  { %77 = vbcast.lane.b32.xlu1 %v75_v16, 256  ;;  %70 = vbcast.lane.b32.xlu0 %v68_v17, 256 }
  0x1f   :  { %365 = vmatpush3.bf16.msra.mxu0 %v385_v24 }
  0x20   :  { %366 = vmatprep.subr.bf16.mxu0 %v414_v1 }
  0x21   :  { %91 = vbcast.lane.b32.xlu1 %v89_v21, 256  ;;  %84 = vbcast.lane.b32.xlu0 %v82_v22, 256 }
  0x23   :  { %367 = vmatpush3.bf16.msra.mxu0 %v386_v25 }
  0x24   :  { %368 = vmatprep.subr.bf16.mxu0 %v414_v1 }
  0x27   :  { %369 = vmatpush3.bf16.msra.mxu0 %v387_v26 }
  0x28   :  { %370 = vmatprep.subr.bf16.mxu0 %v414_v1 }
  0x2b   :  { %371 = vmatpush3.bf16.msra.mxu0 %v388_v27 }
  0x87   :  { %v57_v29 = vpop.permute.xlu1 %56  ;;  %v43_v30 = vpop.permute.xlu0 %42 }
  0x88   :  { %vm95_vm1 = vcmp.eq.s32.totalorder %v57_v29, %v36_v28  ;;  %vm93_vm2 = vcmp.eq.s32.totalorder %v43_v30, %v36_v28 }
  0x89   :  { %v333_v31 = vsel %vm95_vm1, 1.0, %v414_v1  ;;  %v331_v32 = vsel %vm93_vm2, 1.0, %v414_v1 }
  0x8a   :  { %v129_v33 = vrot.slane %v333_v31, 4  ;;  %v117_v34 = vrot.slane %v331_v32, 4 }
  0x8b   :  { %v64_v35 = vpop.permute.xlu1 %63  ;;  %v50_v36 = vpop.permute.xlu0 %49 }
  0x8c   :  { %v130_v37 = vadd.f32 %v333_v31, %v129_v33  ;;  %v118_v38 = vadd.f32 %v331_v32, %v117_v34  ;;  %vm96_vm3 = vcmp.eq.s32.totalorder %v64_v35, %v36_v28  ;;  %vm94_vm4 = vcmp.eq.s32.totalorder %v50_v36, %v36_v28 }
  0x8d   :  { %v334_v39 = vsel %vm96_vm3, 1.0, %v414_v1  ;;  %v332_v40 = vsel %vm94_vm4, 1.0, %v414_v1 }
  0x8e   :  { %v131_v41 = vrot.slane %v130_v37, 2  ;;  %v119_v42 = vrot.slane %v118_v38, 2  ;;  %v135_v43 = vrot.slane %v334_v39, 4  ;;  %v123_v44 = vrot.slane %v332_v40, 4 }
  0x8f   :  { %v78_v45 = vpop.permute.xlu1 %77  ;;  %v71_v46 = vpop.permute.xlu0 %70 }
  0x90   :  { %v132_v47 = vadd.f32 %v131_v41, %v130_v37  ;;  %v120_v48 = vadd.f32 %v119_v42, %v118_v38  ;;  %v136_v49 = vadd.f32 %v334_v39, %v135_v43  ;;  %v124_v50 = vadd.f32 %v332_v40, %v123_v44 }
  0x91   :  { %vm98_vm5 = vcmp.eq.s32.totalorder %v78_v45, %v36_v28  ;;  %vm97_vm6 = vcmp.eq.s32.totalorder %v71_v46, %v36_v28 }
  0x92   :  { %v133_v51 = vrot.slane %v132_v47, 1  ;;  %v121_v52 = vrot.slane %v120_v48, 1  ;;  %v137_v53 = vrot.slane %v136_v49, 2  ;;  %v125_v54 = vrot.slane %v124_v50, 2 }
  0x93   :  { %v336_v55 = vsel %vm98_vm5, 1.0, %v414_v1  ;;  %v335_v56 = vsel %vm97_vm6, 1.0, %v414_v1  ;;  %v92_v57 = vpop.permute.xlu1 %91  ;;  %v85_v58 = vpop.permute.xlu0 %84 }
  0x94   :  { %v122_v59 = vadd.f32 %v121_v52, %v120_v48  ;;  %v138_v60 = vadd.f32 %v137_v53, %v136_v49  ;;  %v126_v61 = vadd.f32 %v125_v54, %v124_v50  ;;  %v147_v62 = vrot.slane %v336_v55, 4 }
  0x95   :  { %v141_v63 = vrot.slane %v335_v56, 4  ;;  %vm100_vm7 = vcmp.eq.s32.totalorder %v92_v57, %v36_v28  ;;  %vm99_vm8 = vcmp.eq.s32.totalorder %v85_v58, %v36_v28  ;;  %v134_v0 = vadd.f32 %v133_v51, %v132_v47 }
  0x96   :  { %v139_v2 = vrot.slane %v138_v60, 1  ;;  %v127_v3 = vrot.slane %v126_v61, 1  ;;  %v148_v4 = vadd.f32 %v336_v55, %v147_v62  ;;  %v338_v6 = vsel %vm100_vm7, 1.0, %v414_v1 }
  0x97   :  { %v142_v5 = vadd.f32 %v335_v56, %v141_v63  ;;  %v337_v7 = vsel %vm99_vm8, 1.0, %v414_v1  ;;  %v174_v8 = vpack.c.bf16 %v122_v59, %v122_v59  ;;  %v159_v13 = vrot.slane %v338_v6, 4 }
  0x98   :  { %v140_v9 = vadd.f32 %v139_v2, %v138_v60  ;;  %v128_v10 = vadd.f32 %v127_v3, %v126_v61  ;;  %v149_v11 = vrot.slane %v148_v4, 2  ;;  %v153_v14 = vrot.slane %v337_v7, 4 }
  0x99   :  { %v143_v12 = vrot.slane %v142_v5, 2  ;;  %v176_v15 = vpack.c.bf16 %v134_v0, %v134_v0  ;;  %v160_v19 = vadd.f32 %v338_v6, %v159_v13  ;;  %v206_v21 = vunpack.c.l.b16 %v174_v8 }
  0x9a   :  { %v175_v16 = vpack.c.bf16 %v128_v10, %v128_v10  ;;  %v150_v17 = vadd.f32 %v149_v11, %v148_v4  ;;  %v154_v20 = vadd.f32 %v337_v7, %v153_v14  ;;  %v177_v22 = vpack.c.bf16 %v140_v9, %v140_v9 }
  0x9b   :  { %v144_v18 = vadd.f32 %v143_v12, %v142_v5  ;;  %v161_v25 = vrot.slane %v160_v19, 2  ;;  %v208_v27 = vunpack.c.l.b16 %v176_v15 }
  0x9c   :  { %v207_v23 = vunpack.c.l.b16 %v175_v16  ;;  %v151_v24 = vrot.slane %v150_v17, 1  ;;  %v155_v26 = vrot.slane %v154_v20, 2  ;;  %v209_v34 = vunpack.c.l.b16 %v177_v22 }
  0x9d   :  { %v145_v1 = vrot.slane %v144_v18, 1  ;;  %v162_v31 = vadd.f32 %v161_v25, %v160_v19 }
  0x9e   :  { %v215_v28 = vsel %vm214_vm9, %v207_v23, %v206_v21  ;;  %v152_v29 = vadd.f32 %v151_v24, %v150_v17  ;;  %v156_v33 = vadd.f32 %v155_v26, %v154_v20 }
  0x9f   :  { %v146_v30 = vadd.f32 %v145_v1, %v144_v18  ;;  %v217_v32 = vsel %vm216_vm10, %v208_v27, %v215_v28  ;;  %v163_v37 = vrot.slane %v162_v31, 1 }
  0xa0   :  { %v179_v35 = vpack.c.bf16 %v152_v29, %v152_v29  ;;  %v157_v38 = vrot.slane %v156_v33, 1  ;;  %v219_v41 = vsel %vm218_vm11, %v209_v34, %v217_v32 }
  0xa1   :  { %v178_v36 = vpack.c.bf16 %v146_v30, %v146_v30  ;;  %v164_v40 = vadd.f32 %v163_v37, %v162_v31 }
  0xa2   :  { %v158_v42 = vadd.f32 %v157_v38, %v156_v33  ;;  %v211_v43 = vunpack.c.l.b16 %v179_v35 }
  0xa3   :  { %v210_v39 = vunpack.c.l.b16 %v178_v36  ;;  %v181_v44 = vpack.c.bf16 %v164_v40, %v164_v40 }
  0xa4   :  { %v180_v45 = vpack.c.bf16 %v158_v42, %v158_v42 }
  0xa5   :  { %v221_v46 = vsel %vm220_vm12, %v210_v39, %v219_v41  ;;  %v213_v47 = vunpack.c.l.b16 %v181_v44 }
  0xa6   :  { %v212_v48 = vunpack.c.l.b16 %v180_v45  ;;  %v223_v49 = vsel %vm222_vm13, %v211_v43, %v221_v46 }
  0xa8   :  { %v225_v50 = vsel %vm224_vm14, %v212_v48, %v223_v49 }
  0xa9   :  { %v227_v51 = vsel %vm226_vm15, %v213_v47, %v225_v50 }
  0xaa   :  { %v228_v52 = vpack.c.b16 %v227_v51, %v227_v51 }
  0xac   :  { %373 = vmatmul.mubr.bf16.vlgmr.msra.gmra.mxu0 %v228_v52 }
 0x16c   :  { %v312_v53 = vpop.f32.mrf.mxu0 }
 0x16d   :  { %v324_v55 = vmul.f32 0.125, %v312_v53 }
 0x16e   :  { %v374_v54 = vpop.f32.mrf.mxu0 }
 0x16f   :  { %325 = vst [vmem:[%s459_s2] sm:$0xff] %v324_v55 }
 0x170   :  { %v315_v56 = vpop.f32.mrf.mxu0 }
 0x172   :  { %v375_v57 = vpop.f32.mrf.mxu0 }
 0x173   :  { %330 = vsyncpa [#allocation3], 1 }

</bundles_post_ra>
